<compile_context>
chip_gen: v7x
topology: tpu7x:2x2x1
jax: 0.10.0
libtpu: 0.0.40
codegen_flags: <defaults>
</compile_context>

<pallas_src>
import functools
import math

import numpy as np
import jax
import jax.numpy as jnp
from jax.experimental import pallas as pl
from jax.experimental.pallas import tpu as pltpu


def _round_up(x, m):
    return ((x + m - 1) // m) * m


# --------------------------------------------------------------------------
# Matmul tiling policy (shared by weight packing at init and by the caller).
# --------------------------------------------------------------------------
_K_TILE_MAX = 4096   # bf16: keeps double-buffered blocks well under 32 MiB VMEM
_N_TILE_MAX = 640


def _kn_tiles(K, N):
    Kp0 = _round_up(K, 128)
    nk = max(1, -(-Kp0 // _K_TILE_MAX))
    tk = _round_up(-(-Kp0 // nk), 128)
    Np0 = _round_up(N, 128)
    nn = max(1, -(-Np0 // _N_TILE_MAX))
    tn = _round_up(-(-Np0 // nn), 128)
    return tk, tn, tk * nk, tn * nn


# --------------------------------------------------------------------------
# Pallas kernels
# --------------------------------------------------------------------------
def _matmul_kernel(a_ref, b_ref, bias_ref, o_ref):
    """bf16 x bf16 -> f32 accumulate into the (resident) output block.
    Bias is fused into the final-K epilogue (single write path, lane dense)."""
    @pl.when(pl.program_id(2) == 0)
    def _():
        o_ref[...] = jnp.zeros_like(o_ref)

    o_ref[...] += jnp.dot(a_ref[...], b_ref[...],
                          preferred_element_type=jnp.float32)

    @pl.when(pl.program_id(2) == pl.num_programs(2) - 1)
    def _():
        o_ref[...] += bias_ref[...]


def _matmul_bias(x2, w_padded, bias):
    """x2: (M, K) f32; w_padded: (Kp, Np) bf16 (pre-padded at init);
    bias: (1, N) f32.  Returns (M, N) f32."""
    M, K = x2.shape
    Nl = bias.shape[1]
    tk, tn, Kp, Np = _kn_tiles(K, Nl)
    assert (Kp, Np) == w_padded.shape, (K, Nl, w_padded.shape)

    Mp = _round_up(M, 8)
    tm = Mp if Mp <= 256 else 256
    Mp = _round_up(M, tm)

    a = jnp.pad(x2.astype(jnp.bfloat16), ((0, Mp - M), (0, Kp - K)))
    bias_p = jnp.pad(bias, ((0, 0), (0, Np - Nl)))

    out = pl.pallas_call(
        _matmul_kernel,
        out_shape=jax.ShapeDtypeStruct((Mp, Np), jnp.float32),
        grid=(Mp // tm, Np // tn, Kp // tk),
        in_specs=[pl.BlockSpec((tm, tk), lambda i, j, k: (i, k)),
                  pl.BlockSpec((tk, tn), lambda i, j, k: (k, j)),
                  pl.BlockSpec((1, tn), lambda i, j, k: (0, j))],
        out_specs=pl.BlockSpec((tm, tn), lambda i, j, k: (i, j)),
        compiler_params=pltpu.CompilerParams(
            dimension_semantics=("parallel", "parallel", "arbitrary")),
    )(a, w_padded, bias_p)
    return out[:M, :Nl]


def _group_norm_kernel(x_ref, g_ref, b_ref, o_ref, *, eps, groups, act):
    """One batch item per grid step; x block is (1, HW, C) in NHWC.
    Group statistics are aggregated with a small one-hot matmul so the lane
    layout never has to be reshaped."""
    x = x_ref[0]                                   # (HW, C) f32
    hw, C = x.shape
    cg = C // groups
    inv_cnt = 1.0 / float(hw * cg)

    grp_of_ch = jax.lax.broadcasted_iota(jnp.int32, (groups, C), 1) // cg
    grp_row = jax.lax.broadcasted_iota(jnp.int32, (groups, C), 0)
    scatter = (grp_of_ch == grp_row).astype(jnp.float32)        # (G, C) one-hot

    ch_sum = jnp.sum(x, axis=0, keepdims=True)                  # (1, C)
    g_mean = jax.lax.dot_general(ch_sum, scatter, (((1,), (1,)), ((), ())),
                                 preferred_element_type=jnp.float32) * inv_cnt
    mean_c = jnp.dot(g_mean, scatter, preferred_element_type=jnp.float32)

    xc = x - mean_c
    ch_ss = jnp.sum(xc * xc, axis=0, keepdims=True)
    g_var = jax.lax.dot_general(ch_ss, scatter, (((1,), (1,)), ((), ())),
                                preferred_element_type=jnp.float32) * inv_cnt
    inv_c = jnp.dot(jax.lax.rsqrt(g_var + eps), scatter,
                    preferred_element_type=jnp.float32)

    y = xc * inv_c * g_ref[...] + b_ref[...]
    if act == "silu":
        y = y * jax.nn.sigmoid(y)
    o_ref[0] = y


def _layer_norm_kernel(x_ref, g_ref, b_ref, o_ref, *, eps):
    x = x_ref[...]
    mean = jnp.mean(x, axis=-1, keepdims=True)
    xc = x - mean
    var = jnp.mean(xc * xc, axis=-1, keepdims=True)
    o_ref[...] = xc * jax.lax.rsqrt(var + eps) * g_ref[...] + b_ref[...]


def _attn_kernel(q_ref, k_ref, v_ref, o_ref, *, n_head, d):
    """All heads fused in one kernel invocation per batch item.
    q/k/v blocks are (1, S/L, C) bf16; output block is lane-dense (1, S, C)."""
    scale = 1.0 / math.sqrt(d)
    for h in range(n_head):
        sl = slice(h * d, (h + 1) * d)
        qh = q_ref[0, :, sl]                                   # (S, d) bf16
        kh = k_ref[0, :, sl]                                   # (L, d) bf16
        vh = v_ref[0, :, sl]
        s = jax.lax.dot_general(qh, kh, (((1,), (1,)), ((), ())),
                                preferred_element_type=jnp.float32) * scale
        m = jnp.max(s, axis=-1, keepdims=True)
        p = jnp.exp(s - m)
        o = jnp.dot(p.astype(jnp.bfloat16), vh,
                    preferred_element_type=jnp.float32)
        o_ref[0, :, sl] = o / jnp.sum(p, axis=-1, keepdims=True)


# --------------------------------------------------------------------------
# Jitted layer wrappers
# --------------------------------------------------------------------------
@functools.partial(jax.jit, static_argnames=("kh", "kw", "stride", "padding"))
def conv2d(x, w, b, *, kh, kw, stride, padding):
    """x: (N, H, W, Cin) NHWC; w: pre-packed (Kp, Np) bf16; b: (1, Cout) f32."""
    N, H, W, Cin = x.shape
    Ho = (H + 2 * padding - kh) // stride + 1
    Wo = (W + 2 * padding - kw) // stride + 1
    if padding:
        x = jnp.pad(x, ((0, 0), (padding, padding), (padding, padding), (0, 0)))
    if kh == 1 and kw == 1 and stride == 1:
        col = x
    else:
        cols = [x[:, i:i + stride * Ho:stride, j:j + stride * Wo:stride, :]
                for i in range(kh) for j in range(kw)]
        col = jnp.concatenate(cols, axis=-1)      # (N, Ho, Wo, kh*kw*Cin)
    col2 = col.reshape(N * Ho * Wo, kh * kw * Cin)
    y = _matmul_bias(col2, w, b)                  # (M, Cout) f32, bias fused
    return y.reshape(N, Ho, Wo, b.shape[1])


@jax.jit
def linear(x, w, b):
    lead = x.shape[:-1]
    x2 = x.reshape(-1, x.shape[-1])
    y = _matmul_bias(x2, w, b)
    return y.reshape(lead + (b.shape[1],))


@functools.partial(jax.jit, static_argnames=("eps", "act", "groups"))
def group_norm(x, g, b, *, eps, act=None, groups=32):
    N, H, W, C = x.shape
    x3 = x.reshape(N, H * W, C)
    out = pl.pallas_call(
        functools.partial(_group_norm_kernel, eps=eps, groups=groups, act=act),
        out_shape=jax.ShapeDtypeStruct((N, H * W, C), jnp.float32),
        grid=(N,),
        in_specs=[pl.BlockSpec((1, H * W, C), lambda n: (n, 0, 0)),
                  pl.BlockSpec((1, C), lambda n: (0, 0)),
                  pl.BlockSpec((1, C), lambda n: (0, 0))],
        out_specs=pl.BlockSpec((1, H * W, C), lambda n: (n, 0, 0)),
        compiler_params=pltpu.CompilerParams(
            dimension_semantics=("parallel",)),
    )(x3, g, b)
    return out.reshape(N, H, W, C)


@jax.jit
def layer_norm(x, g, b):
    lead = x.shape[:-1]
    C = x.shape[-1]
    x2 = x.reshape(-1, C)
    R = x2.shape[0]
    tr = 128 if (R % 128 == 0 and R > 128) else R
    out = pl.pallas_call(
        functools.partial(_layer_norm_kernel, eps=1e-5),
        out_shape=jax.ShapeDtypeStruct((R, C), jnp.float32),
        grid=(R // tr,),
        in_specs=[pl.BlockSpec((tr, C), lambda r: (r, 0)),
                  pl.BlockSpec((1, C), lambda r: (0, 0)),
                  pl.BlockSpec((1, C), lambda r: (0, 0))],
        out_specs=pl.BlockSpec((tr, C), lambda r: (r, 0)),
        compiler_params=pltpu.CompilerParams(
            dimension_semantics=("parallel",)),
    )(x2, g, b)
    return out.reshape(lead + (C,))


@functools.partial(jax.jit, static_argnames=("n_head",))
def multi_head_attention(q, k, v, *, n_head):
    N, S, C = q.shape
    L = k.shape[1]
    d = C // n_head
    return pl.pallas_call(
        functools.partial(_attn_kernel, n_head=n_head, d=d),
        out_shape=jax.ShapeDtypeStruct((N, S, C), jnp.float32),
        grid=(N,),
        in_specs=[pl.BlockSpec((1, S, C), lambda n: (n, 0, 0)),
                  pl.BlockSpec((1, L, C), lambda n: (n, 0, 0)),
                  pl.BlockSpec((1, L, C), lambda n: (n, 0, 0))],
        out_specs=pl.BlockSpec((1, S, C), lambda n: (n, 0, 0)),
        compiler_params=pltpu.CompilerParams(
            dimension_semantics=("parallel",)),
    )(q.astype(jnp.bfloat16), k.astype(jnp.bfloat16), v.astype(jnp.bfloat16))


# --------------------------------------------------------------------------
# Deterministic parameter init (PyTorch-layout draws, then pre-packed once:
# (K, N) layout, padded to the matmul tiles, cast to bf16).
# --------------------------------------------------------------------------
_rng = np.random.default_rng(0)


def _uniform(shape, scale):
    return (_rng.random(shape, dtype=np.float32) - 0.5) * (2.0 * scale)


def _pack_weight(w_kn, bias_n):
    K, N = w_kn.shape
    _, _, Kp, Np = _kn_tiles(K, N)
    wp = np.zeros((Kp, Np), np.float32)
    wp[:K, :N] = w_kn
    return (jnp.asarray(wp, dtype=jnp.bfloat16),
            jnp.asarray(bias_n.reshape(1, N), dtype=jnp.float32))


def init_conv(cin, cout, k):
    fan_in = cin * k * k
    w = _uniform((cout, cin, k, k), 1.0 / math.sqrt(fan_in))      # torch layout
    bias = np.zeros((cout,), np.float32)
    w_kn = np.transpose(w, (2, 3, 1, 0)).reshape(k * k * cin, cout)
    wd, bd = _pack_weight(w_kn, bias)
    return {"w": wd, "b": bd, "k": k}


def init_linear(cin, cout, bias=True):
    w = _uniform((cout, cin), 1.0 / math.sqrt(cin))
    bvec = np.zeros((cout,), np.float32)          # zero bias == no bias
    wd, bd = _pack_weight(np.transpose(w), bvec)
    return {"w": wd, "b": bd}


def init_norm(c):
    return {"g": jnp.ones((1, c), jnp.float32),
            "b": jnp.zeros((1, c), jnp.float32)}


def init_res(cin, cout, n_time=1280):
    p = {"gn_f": init_norm(cin), "conv_f": init_conv(cin, cout, 3),
         "lin_t": init_linear(n_time, cout),
         "gn_m": init_norm(cout), "conv_m": init_conv(cout, cout, 3)}
    if cin != cout:
        p["res"] = init_conv(cin, cout, 1)
    return p


def init_attn(n_head, n_embd, d_context=768):
    c = n_head * n_embd
    return {
        "n_head": n_head,
        "gn": init_norm(c),
        "conv_in": init_conv(c, c, 1),
        "ln1": init_norm(c),
        "attn1_in": init_linear(c, 3 * c, bias=False),
        "attn1_out": init_linear(c, c, bias=True),
        "ln2": init_norm(c),
        "attn2_q": init_linear(c, c, bias=False),
        "attn2_k": init_linear(d_context, c, bias=False),
        "attn2_v": init_linear(d_context, c, bias=False),
        "attn2_out": init_linear(c, c, bias=True),
        "ln3": init_norm(c),
        "geglu1": init_linear(c, 4 * c * 2, bias=True),
        "geglu2": init_linear(4 * c, c, bias=True),
        "conv_out": init_conv(c, c, 1),
    }


# --------------------------------------------------------------------------
# Forward passes (mirror the PyTorch modules; activations are NHWC).
# --------------------------------------------------------------------------
def conv_apply(p, x, *, stride, padding):
    return conv2d(x, p["w"], p["b"], kh=p["k"], kw=p["k"],
                  stride=stride, padding=padding)


def res_fwd(p, x, time):
    residue = x
    h = group_norm(x, p["gn_f"]["g"], p["gn_f"]["b"], eps=1e-5, act="silu")
    h = conv_apply(p["conv_f"], h, stride=1, padding=1)
    t = jax.nn.silu(time)
    t = linear(t, p["lin_t"]["w"], p["lin_t"]["b"])          # (N, Cout)
    h = h + t[:, None, None, :]
    h = group_norm(h, p["gn_m"]["g"], p["gn_m"]["b"], eps=1e-5, act="silu")
    h = conv_apply(p["conv_m"], h, stride=1, padding=1)
    if "res" in p:
        residue = conv_apply(p["res"], residue, stride=1, padding=0)
    return h + residue


def attn_fwd(p, x, context):
    n_head = p["n_head"]
    residue_long = x
    h = group_norm(x, p["gn"]["g"], p["gn"]["b"], eps=1e-6, act=None)
    h = conv_apply(p["conv_in"], h, stride=1, padding=0)
    N, H, W, C = h.shape
    h = h.reshape(N, H * W, C)                               # free in NHWC

    residue_short = h
    t = layer_norm(h, p["ln1"]["g"], p["ln1"]["b"])
    qkv = linear(t, p["attn1_in"]["w"], p["attn1_in"]["b"])
    q, k, v = jnp.split(qkv, 3, axis=-1)
    a = multi_head_attention(q, k, v, n_head=n_head)
    a = linear(a, p["attn1_out"]["w"], p["attn1_out"]["b"])
    h = a + residue_short

    residue_short = h
    t = layer_norm(h, p["ln2"]["g"], p["ln2"]["b"])
    q = linear(t, p["attn2_q"]["w"], p["attn2_q"]["b"])
    k = linear(context, p["attn2_k"]["w"], p["attn2_k"]["b"])
    v = linear(context, p["attn2_v"]["w"], p["attn2_v"]["b"])
    a = multi_head_attention(q, k, v, n_head=n_head)
    a = linear(a, p["attn2_out"]["w"], p["attn2_out"]["b"])
    h = a + residue_short

    residue_short = h
    t = layer_norm(h, p["ln3"]["g"], p["ln3"]["b"])
    g1 = linear(t, p["geglu1"]["w"], p["geglu1"]["b"])
    t, gate = jnp.split(g1, 2, axis=-1)
    t = t * jax.nn.gelu(gate, approximate=False)             # torch F.gelu (erf)
    t = linear(t, p["geglu2"]["w"], p["geglu2"]["b"])
    h = t + residue_short

    h = h.reshape(N, H, W, C)
    out = conv_apply(p["conv_out"], h, stride=1, padding=0)
    return out + residue_long


def upsample_fwd(p, x):
    # TODO(synk): the nearest-2x gather could be fused into the conv's im2col;
    # at these sizes the repeated tensor is tiny so plain JAX repeat is kept.
    x = jnp.repeat(jnp.repeat(x, 2, axis=1), 2, axis=2)
    return conv_apply(p, x, stride=1, padding=1)


def init_unet():
    enc = [
        [("conv", init_conv(4, 320, 3), 1)],
        [("res", init_res(320, 320)), ("attn", init_attn(8, 40))],
        [("res", init_res(320, 320)), ("attn", init_attn(8, 40))],
        [("conv", init_conv(320, 320, 3), 2)],
        [("res", init_res(320, 640)), ("attn", init_attn(8, 80))],
        [("res", init_res(640, 640)), ("attn", init_attn(8, 80))],
        [("conv", init_conv(640, 640, 3), 2)],
        [("res", init_res(640, 1280)), ("attn", init_attn(8, 160))],
        [("res", init_res(1280, 1280)), ("attn", init_attn(8, 160))],
        [("conv", init_conv(1280, 1280, 3), 2)],
        [("res", init_res(1280, 1280))],
        [("res", init_res(1280, 1280))],
    ]
    bott = [("res", init_res(1280, 1280)), ("attn", init_attn(8, 160)),
            ("res", init_res(1280, 1280))]
    dec = [
        [("res", init_res(2560, 1280))],
        [("res", init_res(2560, 1280))],
        [("res", init_res(2560, 1280)), ("up", init_conv(1280, 1280, 3))],
        [("res", init_res(2560, 1280)), ("attn", init_attn(8, 160))],
        [("res", init_res(2560, 1280)), ("attn", init_attn(8, 160))],
        [("res", init_res(1920, 1280)), ("attn", init_attn(8, 160)),
         ("up", init_conv(1280, 1280, 3))],
        [("res", init_res(1920, 640)), ("attn", init_attn(8, 80))],
        [("res", init_res(1280, 640)), ("attn", init_attn(8, 80))],
        [("res", init_res(960, 640)), ("attn", init_attn(8, 80)),
         ("up", init_conv(640, 640, 3))],
        [("res", init_res(960, 320)), ("attn", init_attn(8, 40))],
        [("res", init_res(640, 320)), ("attn", init_attn(8, 40))],
        [("res", init_res(640, 320)), ("attn", init_attn(8, 40))],
    ]
    return {"enc": enc, "bott": bott, "dec": dec}


def apply_layer(layer, x, context, time):
    kind = layer[0]
    if kind == "res":
        return res_fwd(layer[1], x, time)
    if kind == "attn":
        return attn_fwd(layer[1], x, context)
    if kind == "conv":
        return conv_apply(layer[1], x, stride=layer[2], padding=1)
    if kind == "up":
        return upsample_fwd(layer[1], x)
    raise ValueError(kind)


def unet_forward(params, x_nchw, context, time):
    x = jnp.transpose(x_nchw, (0, 2, 3, 1))        # NCHW -> NHWC (boundary only)
    skips = []
    for seq in params["enc"]:
        for layer in seq:
            x = apply_layer(layer, x, context, time)
        skips.append(x)
    for layer in params["bott"]:
        x = apply_layer(layer, x, context, time)
    for seq in params["dec"]:
        x = jnp.concatenate([x, skips.pop()], axis=-1)   # torch.cat(dim=1)
        for layer in seq:
            x = apply_layer(layer, x, context, time)
    return jnp.transpose(x, (0, 3, 1, 2))          # back to NCHW


# --------------------------------------------------------------------------
if __name__ == "__main__":
    key = jax.random.PRNGKey(0)
    kx, kc, kt = jax.random.split(key, 3)
    # Small shapes consistent with the module: latent (N, 4, 16, 16),
    # text context (N, 8, 768), time embedding (1, 1280).
    x = jax.random.normal(kx, (1, 4, 16, 16), dtype=jnp.float32)
    context = jax.random.normal(kc, (1, 8, 768), dtype=jnp.float32)
    time = jax.random.normal(kt, (1, 1280), dtype=jnp.float32)

    params = init_unet()
    out = unet_forward(params, x, context, time)
    out = jax.block_until_ready(out)

    assert out.shape == (1, 320, 16, 16), out.shape
    assert bool(jnp.all(jnp.isfinite(out)))
    print("KERNEL_OK")
</pallas_src>

<mosaic_0001>
module attributes {stable_mosaic.version = 11 : i64} {
  func.func @_matmul_kernel(%arg0: i32, %arg1: i32, %arg2: i32, %arg3: memref<256x128xbf16, #tpu.memory_space<vmem>>, %arg4: memref<128x384xbf16, #tpu.memory_space<vmem>>, %arg5: memref<1x384xf32, #tpu.memory_space<vmem>>, %arg6: memref<256x384xf32, #tpu.memory_space<vmem>>) attributes {dimension_semantics = [#tpu.dimension_semantics<parallel>, #tpu.dimension_semantics<parallel>, #tpu.dimension_semantics<arbitrary>], iteration_bounds = array<i64: 1, 1, 1>, scalar_prefetch = 0 : i64, scratch_operands = 0 : i64, tpu.core_type = #tpu.core_type<tc>, window_params = [{transform_indices = @transform_0, window_bounds = array<i64: 256, 128>}, {transform_indices = @transform_1, window_bounds = array<i64: 128, 384>}, {transform_indices = @transform_2, window_bounds = array<i64: 1, 384>}, {transform_indices = @transform_3, window_bounds = array<i64: 256, 384>}]} {
    %c0_i32 = arith.constant 0 : i32
    %0 = arith.cmpi eq, %arg2, %c0_i32 : i32
    %1 = arith.extui %0 : i1 to i32
    %c0_i32_0 = arith.constant 0 : i32
    %2 = arith.cmpi ne, %1, %c0_i32_0 : i32
    scf.if %2 {
      %cst_10 = arith.constant 0.000000e+00 : f32
      %12 = vector.broadcast %cst_10 : f32 to vector<256x384xf32>
      %c0_11 = arith.constant 0 : index
      %c0_12 = arith.constant 0 : index
      %13 = vector.load %arg6[%c0_11, %c0_12] : memref<256x384xf32, #tpu.memory_space<vmem>>, vector<256x384xf32>
      tpu.vector_store %arg6[%c0_11, %c0_12], %12 {strides = array<i32>} : memref<256x384xf32, #tpu.memory_space<vmem>>, vector<256x384xf32>,
    } else {
    }
    %c0 = arith.constant 0 : index
    %c0_1 = arith.constant 0 : index
    %3 = vector.load %arg6[%c0, %c0_1] : memref<256x384xf32, #tpu.memory_space<vmem>>, vector<256x384xf32>
    %c0_2 = arith.constant 0 : index
    %c0_3 = arith.constant 0 : index
    %4 = vector.load %arg3[%c0_2, %c0_3] : memref<256x128xbf16, #tpu.memory_space<vmem>>, vector<256x128xbf16>
    %c0_4 = arith.constant 0 : index
    %c0_5 = arith.constant 0 : index
    %5 = vector.load %arg4[%c0_4, %c0_5] : memref<128x384xbf16, #tpu.memory_space<vmem>>, vector<128x384xbf16>
    %cst = arith.constant dense<0.000000e+00> : vector<256x384xf32>
    %6 = tpu.matmul %4, %5, %cst {dimension_numbers = #tpu.dot_dimension_numbers<[1], [0], [0], [1], [0, 0, 1, 1], [], []>} : vector<256x128xbf16>, vector<128x384xbf16>, vector<256x384xf32> -> vector<256x384xf32>
    %7 = arith.addf %3, %6 : vector<256x384xf32>
    %c0_6 = arith.constant 0 : index
    %c0_7 = arith.constant 0 : index
    %8 = vector.load %arg6[%c0_6, %c0_7] : memref<256x384xf32, #tpu.memory_space<vmem>>, vector<256x384xf32>
    tpu.vector_store %arg6[%c0_6, %c0_7], %7 {strides = array<i32>} : memref<256x384xf32, #tpu.memory_space<vmem>>, vector<256x384xf32>,
    %c0_i32_8 = arith.constant 0 : i32
    %9 = arith.cmpi eq, %arg2, %c0_i32_8 : i32
    %10 = arith.extui %9 : i1 to i32
    %c0_i32_9 = arith.constant 0 : i32
    %11 = arith.cmpi ne, %10, %c0_i32_9 : i32
    scf.if %11 {
      %c0_10 = arith.constant 0 : index
      %c0_11 = arith.constant 0 : index
      %12 = vector.load %arg6[%c0_10, %c0_11] : memref<256x384xf32, #tpu.memory_space<vmem>>, vector<256x384xf32>
      %c0_12 = arith.constant 0 : index
      %c0_13 = arith.constant 0 : index
      %13 = vector.load %arg5[%c0_12, %c0_13] : memref<1x384xf32, #tpu.memory_space<vmem>>, vector<1x384xf32>
      %14 = vector.broadcast %13 : vector<1x384xf32> to vector<256x384xf32>
      %15 = arith.addf %12, %14 : vector<256x384xf32>
      %c0_14 = arith.constant 0 : index
      %c0_15 = arith.constant 0 : index
      %16 = vector.load %arg6[%c0_14, %c0_15] : memref<256x384xf32, #tpu.memory_space<vmem>>, vector<256x384xf32>
      tpu.vector_store %arg6[%c0_14, %c0_15], %15 {strides = array<i32>} : memref<256x384xf32, #tpu.memory_space<vmem>>, vector<256x384xf32>,
    } else {
    }
    return
  }
  func.func @transform_0(%arg0: i32, %arg1: i32, %arg2: i32) -> (i32, i32) {
    %c0_i32 = arith.constant 0 : i32
    return %arg0, %arg2 : i32, i32
  }
  func.func @transform_1(%arg0: i32, %arg1: i32, %arg2: i32) -> (i32, i32) {
    %c0_i32 = arith.constant 0 : i32
    return %arg2, %arg1 : i32, i32
  }
  func.func @transform_2(%arg0: i32, %arg1: i32, %arg2: i32) -> (i32, i32) {
    %c0_i32 = arith.constant 0 : i32
    %c0_i32_0 = arith.constant 0 : i32
    return %c0_i32, %arg1 : i32, i32
  }
  func.func @transform_3(%arg0: i32, %arg1: i32, %arg2: i32) -> (i32, i32) {
    %c0_i32 = arith.constant 0 : i32
    return %arg0, %arg1 : i32, i32
  }
}

</mosaic_0001>

<bundles_post_ra>
// kernel: conv2d.1
= control target key start
LH: loop header
LB: loop body
LE: loop exit
PB: predicated region body
PF: predicated region fallthrough
CT: control target
= control target key end

     0   :  { %v1575_v2 = vmov 0   ;;  %s1870_s0 = inlined_call_operand.vmem [shape: bf16[256,128], index: 0, kind: input, shape index: {}]   ;;  %s1871_s1 = inlined_call_operand.vmem [shape: bf16[128,384], index: 1, kind: input, shape index: {}]   ;;  %s1872_s2 = inlined_call_operand.vmem [shape: f32[1,384], index: 2, kind: input, shape index: {}]   ;;  %s1873_s3 = inlined_call_operand.hbm [shape: f32[256,384], index: 3, kind: output, shape index: {}]  }
   0x1   :  { %v1503_v0 = vld [vmem:[%s1871_s1 + $0x4] ss:$12 sps:$4 sm:$0xff]   ;;  %v1505_v1 = vld [vmem:[%s1871_s1] ss:$12 sps:$4 sm:$0xff]   ;;  %532 = vmatprep.mubr.bf16.mxu0 %v1575_v2  ;;  %652 = vmatprep.mubr.bf16.mxu1 %v1575_v2  ;;  %v1506_v3 = vld [vmem:[%s1871_s1 + $0x1c] ss:$12 sps:$4 sm:$0xff]  }
   0x2   :  { %500 = vmatprep.subr.bf16.mxu0 %v1503_v0  ;;  %1482 = vmatprep.subr.bf16.mxu1 %v1503_v0  ;;  %v1508_v4 = vld [vmem:[%s1871_s1 + $0x18] ss:$12 sps:$4 sm:$0xff]   ;;  %v1509_v5 = vld [vmem:[%s1871_s1 + $0x34] ss:$12 sps:$4 sm:$0xff]   ;;  %v1511_v6 = vld [vmem:[%s1871_s1 + $0x30] ss:$12 sps:$4 sm:$0xff]  }
   0x3   :  { %501 = vmatpush1.bf16.msra.mxu0 %v1505_v1  ;;  %1490 = vmatpush1.bf16.msra.mxu1 %v1505_v1  ;;  %v1512_v7 = vld [vmem:[%s1871_s1 + $0x4c] ss:$12 sps:$4 sm:$0xff]   ;;  %v1514_v8 = vld [vmem:[%s1871_s1 + $0x48] ss:$12 sps:$4 sm:$0xff]   ;;  %v1515_v9 = vld [vmem:[%s1871_s1 + $0x64] ss:$12 sps:$4 sm:$0xff]  }
   0x4   :  { %502 = vmatprep.subr.bf16.mxu0 %v1506_v3  ;;  %1483 = vmatprep.subr.bf16.mxu1 %v1506_v3  ;;  %v1517_v10 = vld [vmem:[%s1871_s1 + $0x60] ss:$12 sps:$4 sm:$0xff]   ;;  %v1518_v11 = vld [vmem:[%s1871_s1 + $0x7c] ss:$12 sps:$4 sm:$0xff]   ;;  %v1520_v12 = vld [vmem:[%s1871_s1 + $0x78] ss:$12 sps:$4 sm:$0xff]  }
   0x5   :  { %v1521_v13 = vld [vmem:[%s1871_s1 + $0x94] ss:$12 sps:$4 sm:$0xff]   ;;  %v1523_v14 = vld [vmem:[%s1871_s1 + $0x90] ss:$12 sps:$4 sm:$0xff]   ;;  %v1524_v15 = vld [vmem:[%s1871_s1 + $0xac] ss:$12 sps:$4 sm:$0xff]  }
   0x6   :  { %v1526_v16 = vld [vmem:[%s1871_s1 + $0xa8] ss:$12 sps:$4 sm:$0xff]   ;;  %v1527_v18 = vld [vmem:[%s1870_s0] sm:$0xff]  }
   0x7   :  { %503 = vmatpush1.bf16.msra.mxu0 %v1508_v4  ;;  %1491 = vmatpush1.bf16.msra.mxu1 %v1508_v4  ;;  %v1529_v17 = vld [vmem:[%s1871_s1 + $0x8] ss:$12 sps:$4 sm:$0xff]   ;;  %v1658_v19 = vld [vmem:[%s1870_s0 + $0x60] sm:$0xff]  }
   0x8   :  { %504 = vmatprep.subr.bf16.mxu0 %v1509_v5  ;;  %1484 = vmatprep.subr.bf16.mxu1 %v1509_v5  ;;  %v1530_v20 = vld [vmem:[%s1871_s1 + $0x20] ss:$12 sps:$4 sm:$0xff]  }
   0xb   :  { %505 = vmatpush1.bf16.msra.mxu0 %v1511_v6  ;;  %1492 = vmatpush1.bf16.msra.mxu1 %v1511_v6 }
   0xc   :  { %506 = vmatprep.subr.bf16.mxu0 %v1512_v7  ;;  %1485 = vmatprep.subr.bf16.mxu1 %v1512_v7 }
   0xf   :  { %507 = vmatpush1.bf16.msra.mxu0 %v1514_v8  ;;  %1493 = vmatpush1.bf16.msra.mxu1 %v1514_v8 }
  0x10   :  { %508 = vmatprep.subr.bf16.mxu0 %v1515_v9  ;;  %1486 = vmatprep.subr.bf16.mxu1 %v1515_v9 }
  0x13   :  { %509 = vmatpush1.bf16.msra.mxu0 %v1517_v10  ;;  %1494 = vmatpush1.bf16.msra.mxu1 %v1517_v10 }
  0x14   :  { %510 = vmatprep.subr.bf16.mxu0 %v1518_v11  ;;  %1487 = vmatprep.subr.bf16.mxu1 %v1518_v11 }
  0x17   :  { %511 = vmatpush1.bf16.msra.mxu0 %v1520_v12  ;;  %1495 = vmatpush1.bf16.msra.mxu1 %v1520_v12 }
  0x18   :  { %512 = vmatprep.subr.bf16.mxu0 %v1521_v13  ;;  %1488 = vmatprep.subr.bf16.mxu1 %v1521_v13 }
  0x1b   :  { %513 = vmatpush1.bf16.msra.mxu0 %v1523_v14  ;;  %1496 = vmatpush1.bf16.msra.mxu1 %v1523_v14 }
  0x1c   :  { %514 = vmatprep.subr.bf16.mxu0 %v1524_v15  ;;  %1489 = vmatprep.subr.bf16.mxu1 %v1524_v15 }
  0x1f   :  { %515 = vmatpush1.bf16.msra.mxu0 %v1526_v16  ;;  %1497 = vmatpush1.bf16.msra.mxu1 %v1526_v16 }
  0x20   :  { %1434 = vmatprep.subr.bf16.mxu1 %v1529_v17 }
  0x22   :  { %533 = vmatmul.mubr.bf16.vlgmr.msra.gmra.mrb[0].mxu0 %v1527_v18  ;;  %653 = vmatmul.mubr.bf16.vlgmr.msra.gmra.mrb[0].mxu1 %v1658_v19 }
  0x23   :  { %8 = vsyncpa [#allocation3], 0  ;;  %1435 = vmatpush3.bf16.msra.mxu1 %v1529_v17  ;;  %542 = vmatprep.mubr.bf16.mxu0 %v1575_v2  ;;  %v1533_v21 = vld [vmem:[%s1871_s1 + $0x38] ss:$12 sps:$4 sm:$0xff]   ;;  %v1531_v22 = vld [vmem:[%s1870_s0 + $0x8] sm:$0xff]   ;;  %v1147_v41 = vlaneseq }
  0x24   :  { %1436 = vmatprep.subr.bf16.mxu1 %v1530_v20  ;;  %662 = vmatprep.mubr.bf16.mxu1 %v1575_v2  ;;  %v1675_v23 = vld [vmem:[%s1870_s0 + $0x68] sm:$0xff]   ;;  %v1534_v24 = vld [vmem:[%s1871_s1 + $0x50] ss:$12 sps:$4 sm:$0xff]   ;;  %v1541_v29 = vld [vmem:[%s1871_s1 + $0x98] ss:$12 sps:$4 sm:$0xff]  }
  0x25   :  { %v1537_v25 = vld [vmem:[%s1871_s1 + $0x68] ss:$12 sps:$4 sm:$0xff]   ;;  %v1538_v28 = vld [vmem:[%s1871_s1 + $0x80] ss:$12 sps:$4 sm:$0xff]   ;;  %v1539_v30 = vld [vmem:[%s1870_s0 + $0x18] sm:$0xff]   ;;  %v1743_v42 = vshrl.u32 %v1147_v41, 7 }
  0x26   :  { %v1535_v26 = vld [vmem:[%s1870_s0 + $0x10] sm:$0xff]   ;;  %v1540_v31 = vld [vmem:[%s1870_s0 + $0x78] sm:$0xff]   ;;  %v1543_v33 = vld [vmem:[%s1870_s0 + $0x20] sm:$0xff]  }
  0x27   :  { %1437 = vmatpush3.bf16.msra.mxu1 %v1530_v20  ;;  %v1536_v27 = vld [vmem:[%s1870_s0 + $0x70] sm:$0xff]   ;;  %v1544_v34 = vld [vmem:[%s1870_s0 + $0x28] sm:$0xff]   ;;  %v1546_v36 = vld [vmem:[%s1870_s0 + $0x38] sm:$0xff]   ;;  %v1149_v43 = vsub.s32 0, %v1743_v42  ;;  %v1153_v45 = vsub.s32 1, %v1743_v42 }
  0x28   :  { %1438 = vmatprep.subr.bf16.mxu1 %v1533_v21  ;;  %v1542_v32 = vld [vmem:[%s1871_s1 + $0xb0] ss:$12 sps:$4 sm:$0xff]   ;;  %v1547_v37 = vld [vmem:[%s1870_s0 + $0x40] sm:$0xff]   ;;  %v1548_v38 = vld [vmem:[%s1870_s0 + $0x48] sm:$0xff]  }
  0x29   :  { %v1545_v35 = vld [vmem:[%s1870_s0 + $0x30] sm:$0xff]   ;;  %v1550_v40 = vld [vmem:[%s1870_s0 + $0x58] sm:$0xff]   ;;  %v1749_v44 = vld [vmem:[%s1872_s2] sm:$0x7]  ;;  %s1576_s2 = smov [#allocation2]  }
  0x2a   :  { %543 = vmatmul.mubr.bf16.gmra.mrb[4].mxu0 %v1531_v22  ;;  %663 = vmatmul.mubr.bf16.gmra.mrb[4].mxu1 %v1675_v23  ;;  %v1549_v39 = vld [vmem:[%s1870_s0 + $0x50] sm:$0xff]   ;;  %v1753_v46 = vrot.slane %v1749_v44, %v1149_v43  ;;  %v1756_v49 = vrot.slane %v1749_v44, %v1153_v45  ;;  %s1359_s11 = sshll.u32 %s1576_s2, 4  ;;  %s1360_s11 = int_to_ptr.vmem [resolvable:$true] %s1359_s11 }
  0x2b   :  { %1439 = vmatpush3.bf16.msra.mxu1 %v1533_v21  ;;  %552 = vmatprep.mubr.bf16.mxu0 %v1575_v2  ;;  %s1551_s12 = scalar_lea.vmem %s1360_s11, 12288  ;;  %p1556_p1 = scmp.lt.s32.totalorder %s1360_s11, %s1360_s11 }
  0x2c   :  { %1440 = vmatprep.subr.bf16.mxu1 %v1534_v24  ;;  %672 = vmatprep.mubr.bf16.mxu1 %v1575_v2  ;;  %p1552_p0 = scmp.ne.s32.totalorder %s1360_s11, %s1551_s12  ;;  %p1557_p2 = scmp.lt.s32.totalorder %s1551_s12, %s1551_s12 }
  0x2e   :  { %p1558_p3 = por %p1557_p2, %p1556_p1 }
  0x2f   :  { %1441 = vmatpush3.bf16.msra.mxu1 %v1534_v24 }
  0x30   :  { %1442 = vmatprep.subr.bf16.mxu1 %v1537_v25  ;;  %p1559_p4 = pnand %p1558_p3, %p1552_p0 }
  0x32   :  { %553 = vmatmul.mubr.bf16.gmra.mrb[8].mxu0 %v1535_v26  ;;  %673 = vmatmul.mubr.bf16.gmra.mrb[8].mxu1 %v1536_v27 }
  0x33   :  { %1443 = vmatpush3.bf16.msra.mxu1 %v1537_v25  ;;  %562 = vmatprep.mubr.bf16.mxu0 %v1575_v2 }
  0x34   :  { %1444 = vmatprep.subr.bf16.mxu1 %v1538_v28  ;;  %682 = vmatprep.mubr.bf16.mxu1 %v1575_v2 }
  0x37   :  { %1445 = vmatpush3.bf16.msra.mxu1 %v1538_v28 }
  0x38   :  { %1446 = vmatprep.subr.bf16.mxu1 %v1541_v29 }
  0x3a   :  { %563 = vmatmul.mubr.bf16.gmra.mrb[12].mxu0 %v1539_v30  ;;  %683 = vmatmul.mubr.bf16.gmra.mrb[12].mxu1 %v1540_v31 }
  0x3b   :  { %1447 = vmatpush3.bf16.msra.mxu1 %v1541_v29  ;;  %572 = vmatprep.mubr.bf16.mxu0 %v1575_v2 }
  0x3c   :  { %1448 = vmatprep.subr.bf16.mxu1 %v1542_v32  ;;  %1450 = vmatprep.mubr.bf16.mxu1 %v1527_v18 }
  0x3f   :  { %1449 = vmatpush3.bf16.msra.mxu1 %v1542_v32 }
  0x42   :  { %573 = vmatmul.mubr.bf16.gmra.mrb[16].mxu0 %v1543_v33  ;;  %1451 = vmatmul.mubr.bf16.vlgmr.msra.gmra.mrb[16].mxu1 %v1531_v22 }
  0x43   :  { %582 = vmatprep.mubr.bf16.mxu0 %v1575_v2  ;;  %1454 = vmatprep.mubr.bf16.mxu1 %v1535_v26 }
  0x4a   :  { %583 = vmatmul.mubr.bf16.gmra.mrb[20].mxu0 %v1544_v34  ;;  %1455 = vmatmul.mubr.bf16.gmra.mrb[20].mxu1 %v1539_v30 }
  0x4b   :  { %592 = vmatprep.mubr.bf16.mxu0 %v1575_v2  ;;  %1458 = vmatprep.mubr.bf16.mxu1 %v1543_v33 }
  0x52   :  { %593 = vmatmul.mubr.bf16.gmra.mrb[24].mxu0 %v1545_v35  ;;  %1459 = vmatmul.mubr.bf16.gmra.mrb[24].mxu1 %v1544_v34 }
  0x53   :  { %602 = vmatprep.mubr.bf16.mxu0 %v1575_v2  ;;  %1462 = vmatprep.mubr.bf16.mxu1 %v1545_v35 }
  0x5a   :  { %603 = vmatmul.mubr.bf16.gmra.mrb[28].mxu0 %v1546_v36  ;;  %1463 = vmatmul.mubr.bf16.gmra.mrb[28].mxu1 %v1546_v36 }
  0x5b   :  { %612 = vmatprep.mubr.bf16.mxu0 %v1575_v2  ;;  %1466 = vmatprep.mubr.bf16.mxu1 %v1547_v37 }
  0x62   :  { %613 = vmatmul.mubr.bf16.gmra.mrb[32].mxu0 %v1547_v37  ;;  %1467 = vmatmul.mubr.bf16.gmra.mrb[32].mxu1 %v1548_v38 }
  0x63   :  { %622 = vmatprep.mubr.bf16.mxu0 %v1575_v2  ;;  %1470 = vmatprep.mubr.bf16.mxu1 %v1549_v39 }
  0x6a   :  { %623 = vmatmul.mubr.bf16.gmra.mrb[36].mxu0 %v1548_v38  ;;  %1471 = vmatmul.mubr.bf16.gmra.mrb[36].mxu1 %v1550_v40  ;;  %v1157_v38 = vsub.s32 2, %v1743_v42 }
  0x6b   :  { %632 = vmatprep.mubr.bf16.mxu0 %v1575_v2  ;;  %1474 = vmatprep.mubr.bf16.mxu1 %v1658_v19 }
  0x72   :  { %633 = vmatmul.mubr.bf16.gmra.mrb[40].mxu0 %v1549_v39  ;;  %1475 = vmatmul.mubr.bf16.gmra.mrb[40].mxu1 %v1675_v23 }
  0x73   :  { %642 = vmatprep.mubr.bf16.mxu0 %v1575_v2  ;;  %1478 = vmatprep.mubr.bf16.mxu1 %v1536_v27 }
  0x7a   :  { %643 = vmatmul.mubr.bf16.gmra.mrb[44].mxu0 %v1550_v40  ;;  %1479 = vmatmul.mubr.bf16.gmra.mrb[44].mxu1 %v1540_v31 }
  0xf5   :  { %v534_v47 = vpop.f32.mrb[0].mxu0  ;;  %v654_v48 = vpop.f32.mrb[0].mxu1 }
  0xf6   :  { %v536_v50 = vpop.f32.mrb[1].mxu0  ;;  %v656_v51 = vpop.f32.mrb[1].mxu1  ;;  %v1162_v54 = vadd.f32 %v1753_v46, %v534_v47  ;;  %v1234_v55 = vadd.f32 %v1753_v46, %v654_v48 }
  0xf7   :  { %v538_v52 = vpop.f32.mrb[2].mxu0  ;;  %v658_v53 = vpop.f32.mrb[2].mxu1  ;;  %v1163_v58 = vadd.f32 %v1756_v49, %v536_v50  ;;  %v1235_v59 = vadd.f32 %v1756_v49, %v656_v51 }
  0xf8   :  { %v540_v56 = vpop.f32.mrb[3].mxu0  ;;  %v660_v57 = vpop.f32.mrb[3].mxu1  ;;  %1258 = vst [vmem:[#allocation2] sm:$0xff] %v1162_v54  ;;  %1330 = vst [vmem:[#allocation2 + $0x240] sm:$0xff] %v1234_v55  ;;  %v1165_v60 = vadd.f32 %v1753_v46, %v538_v52  ;;  %v1237_v61 = vadd.f32 %v1753_v46, %v658_v53  ;;  %v1792_v52 = vrot.slane %v1749_v44, %v1157_v38 }
  0xf9   :  { %1259 = vst [vmem:[#allocation2 + $0x8] sm:$0xff] %v1163_v58  ;;  %1331 = vst [vmem:[#allocation2 + $0x248] sm:$0xff] %v1235_v59  ;;  %v1166_v62 = vadd.f32 %v1756_v49, %v540_v56  ;;  %v1238_v63 = vadd.f32 %v1756_v49, %v660_v57 }
  0xfa   :  { %1261 = vst [vmem:[#allocation2 + $0x18] sm:$0xff] %v1165_v60  ;;  %1333 = vst [vmem:[#allocation2 + $0x258] sm:$0xff] %v1237_v61 }
  0xfb   :  { %1262 = vst [vmem:[#allocation2 + $0x20] sm:$0xff] %v1166_v62  ;;  %1334 = vst [vmem:[#allocation2 + $0x260] sm:$0xff] %v1238_v63 }
  0xfd   :  { %v544_v0 = vpop.f32.mrb[4].mxu0  ;;  %v664_v1 = vpop.f32.mrb[4].mxu1 }
  0xfe   :  { %v546_v2 = vpop.f32.mrb[5].mxu0  ;;  %v666_v3 = vpop.f32.mrb[5].mxu1  ;;  %v1168_v6 = vadd.f32 %v1753_v46, %v544_v0  ;;  %v1240_v7 = vadd.f32 %v1753_v46, %v664_v1 }
  0xff   :  { %v548_v4 = vpop.f32.mrb[6].mxu0  ;;  %v668_v5 = vpop.f32.mrb[6].mxu1  ;;  %v1169_v10 = vadd.f32 %v1756_v49, %v546_v2  ;;  %v1241_v11 = vadd.f32 %v1756_v49, %v666_v3 }
 0x100   :  { %v550_v8 = vpop.f32.mrb[7].mxu0  ;;  %v670_v9 = vpop.f32.mrb[7].mxu1  ;;  %1264 = vst [vmem:[#allocation2 + $0x30] sm:$0xff] %v1168_v6  ;;  %1336 = vst [vmem:[#allocation2 + $0x270] sm:$0xff] %v1240_v7  ;;  %v1171_v12 = vadd.f32 %v1753_v46, %v548_v4  ;;  %v1243_v13 = vadd.f32 %v1753_v46, %v668_v5 }
 0x101   :  { %1265 = vst [vmem:[#allocation2 + $0x38] sm:$0xff] %v1169_v10  ;;  %1337 = vst [vmem:[#allocation2 + $0x278] sm:$0xff] %v1241_v11  ;;  %v1172_v14 = vadd.f32 %v1756_v49, %v550_v8  ;;  %v1244_v15 = vadd.f32 %v1756_v49, %v670_v9 }
 0x102   :  { %1267 = vst [vmem:[#allocation2 + $0x48] sm:$0xff] %v1171_v12  ;;  %1339 = vst [vmem:[#allocation2 + $0x288] sm:$0xff] %v1243_v13 }
 0x103   :  { %1268 = vst [vmem:[#allocation2 + $0x50] sm:$0xff] %v1172_v14  ;;  %1340 = vst [vmem:[#allocation2 + $0x290] sm:$0xff] %v1244_v15 }
 0x105   :  { %v554_v16 = vpop.f32.mrb[8].mxu0  ;;  %v674_v17 = vpop.f32.mrb[8].mxu1 }
 0x106   :  { %v556_v18 = vpop.f32.mrb[9].mxu0  ;;  %v676_v19 = vpop.f32.mrb[9].mxu1  ;;  %v1174_v22 = vadd.f32 %v1753_v46, %v554_v16  ;;  %v1246_v23 = vadd.f32 %v1753_v46, %v674_v17 }
 0x107   :  { %v558_v20 = vpop.f32.mrb[10].mxu0  ;;  %v678_v21 = vpop.f32.mrb[10].mxu1  ;;  %v1175_v26 = vadd.f32 %v1756_v49, %v556_v18  ;;  %v1247_v27 = vadd.f32 %v1756_v49, %v676_v19 }
 0x108   :  { %v560_v24 = vpop.f32.mrb[11].mxu0  ;;  %v680_v25 = vpop.f32.mrb[11].mxu1  ;;  %1270 = vst [vmem:[#allocation2 + $0x60] sm:$0xff] %v1174_v22  ;;  %1342 = vst [vmem:[#allocation2 + $0x2a0] sm:$0xff] %v1246_v23  ;;  %v1177_v28 = vadd.f32 %v1753_v46, %v558_v20  ;;  %v1249_v29 = vadd.f32 %v1753_v46, %v678_v21 }
 0x109   :  { %1271 = vst [vmem:[#allocation2 + $0x68] sm:$0xff] %v1175_v26  ;;  %1343 = vst [vmem:[#allocation2 + $0x2a8] sm:$0xff] %v1247_v27  ;;  %v1178_v30 = vadd.f32 %v1756_v49, %v560_v24  ;;  %v1250_v31 = vadd.f32 %v1756_v49, %v680_v25 }
 0x10a   :  { %1273 = vst [vmem:[#allocation2 + $0x78] sm:$0xff] %v1177_v28  ;;  %1345 = vst [vmem:[#allocation2 + $0x2b8] sm:$0xff] %v1249_v29 }
 0x10b   :  { %1274 = vst [vmem:[#allocation2 + $0x80] sm:$0xff] %v1178_v30  ;;  %1346 = vst [vmem:[#allocation2 + $0x2c0] sm:$0xff] %v1250_v31 }
 0x10d   :  { %v564_v32 = vpop.f32.mrb[12].mxu0  ;;  %v684_v33 = vpop.f32.mrb[12].mxu1 }
 0x10e   :  { %v566_v34 = vpop.f32.mrb[13].mxu0  ;;  %v686_v35 = vpop.f32.mrb[13].mxu1  ;;  %v1180_v39 = vadd.f32 %v1753_v46, %v564_v32  ;;  %v1252_v40 = vadd.f32 %v1753_v46, %v684_v33 }
 0x10f   :  { %v568_v36 = vpop.f32.mrb[14].mxu0  ;;  %v688_v37 = vpop.f32.mrb[14].mxu1  ;;  %v1181_v45 = vadd.f32 %v1756_v49, %v566_v34  ;;  %v1253_v47 = vadd.f32 %v1756_v49, %v686_v35 }
 0x110   :  { %v570_v41 = vpop.f32.mrb[15].mxu0  ;;  %v690_v43 = vpop.f32.mrb[15].mxu1  ;;  %1276 = vst [vmem:[#allocation2 + $0x90] sm:$0xff] %v1180_v39  ;;  %1348 = vst [vmem:[#allocation2 + $0x2d0] sm:$0xff] %v1252_v40  ;;  %v1183_v48 = vadd.f32 %v1753_v46, %v568_v36  ;;  %v1255_v50 = vadd.f32 %v1753_v46, %v688_v37 }
 0x111   :  { %1277 = vst [vmem:[#allocation2 + $0x98] sm:$0xff] %v1181_v45  ;;  %1349 = vst [vmem:[#allocation2 + $0x2d8] sm:$0xff] %v1253_v47  ;;  %v1184_v42 = vadd.f32 %v1756_v49, %v570_v41  ;;  %v1256_v51 = vadd.f32 %v1756_v49, %v690_v43 }
 0x112   :  { %1279 = vst [vmem:[#allocation2 + $0xa8] sm:$0xff] %v1183_v48  ;;  %1351 = vst [vmem:[#allocation2 + $0x2e8] sm:$0xff] %v1255_v50 }
 0x113   :  { %1280 = vst [vmem:[#allocation2 + $0xb0] sm:$0xff] %v1184_v42  ;;  %1352 = vst [vmem:[#allocation2 + $0x2f0] sm:$0xff] %v1256_v51 }
 0x115   :  { %v574_v53 = vpop.f32.mrb[16].mxu0  ;;  %v1452_v54 = vpop.f32.mrb[16].mxu1 }
 0x116   :  { %v576_v55 = vpop.f32.mrb[17].mxu0  ;;  %v727_v56 = vpop.f32.mrb[17].mxu1  ;;  %v1186_v59 = vadd.f32 %v1753_v46, %v574_v53  ;;  %v1170_v60 = vadd.f32 %v1452_v54, %v1792_v52 }
 0x117   :  { %v578_v57 = vpop.f32.mrb[18].mxu0  ;;  %v1453_v58 = vpop.f32.mrb[18].mxu1  ;;  %v1187_v63 = vadd.f32 %v1756_v49, %v576_v55  ;;  %v1164_v0 = vadd.f32 %v1792_v52, %v727_v56 }
 0x118   :  { %v580_v61 = vpop.f32.mrb[19].mxu0  ;;  %v730_v62 = vpop.f32.mrb[19].mxu1  ;;  %1282 = vst [vmem:[#allocation2 + $0xc0] sm:$0xff] %v1186_v59  ;;  %1266 = vst [vmem:[#allocation2 + $0x40] sm:$0xff] %v1170_v60  ;;  %v1189_v44 = vadd.f32 %v1753_v46, %v578_v57  ;;  %v1173_v1 = vadd.f32 %v1453_v58, %v1792_v52 }
 0x119   :  { %1283 = vst [vmem:[#allocation2 + $0xc8] sm:$0xff] %v1187_v63  ;;  %1260 = vst [vmem:[#allocation2 + $0x10] sm:$0xff] %v1164_v0  ;;  %v1190_v2 = vadd.f32 %v1756_v49, %v580_v61  ;;  %v1167_v3 = vadd.f32 %v1792_v52, %v730_v62 }
 0x11a   :  { %1285 = vst [vmem:[#allocation2 + $0xd8] sm:$0xff] %v1189_v44  ;;  %1269 = vst [vmem:[#allocation2 + $0x58] sm:$0xff] %v1173_v1 }
 0x11b   :  { %1286 = vst [vmem:[#allocation2 + $0xe0] sm:$0xff] %v1190_v2  ;;  %1263 = vst [vmem:[#allocation2 + $0x28] sm:$0xff] %v1167_v3 }
 0x11d   :  { %v584_v4 = vpop.f32.mrb[20].mxu0  ;;  %v1456_v5 = vpop.f32.mrb[20].mxu1 }
 0x11e   :  { %v586_v6 = vpop.f32.mrb[21].mxu0  ;;  %v743_v7 = vpop.f32.mrb[21].mxu1  ;;  %v1192_v10 = vadd.f32 %v1753_v46, %v584_v4  ;;  %v1182_v11 = vadd.f32 %v1456_v5, %v1792_v52 }
 0x11f   :  { %v588_v8 = vpop.f32.mrb[22].mxu0  ;;  %v1457_v9 = vpop.f32.mrb[22].mxu1  ;;  %v1193_v14 = vadd.f32 %v1756_v49, %v586_v6  ;;  %v1176_v15 = vadd.f32 %v1792_v52, %v743_v7 }
 0x120   :  { %v590_v12 = vpop.f32.mrb[23].mxu0  ;;  %v746_v13 = vpop.f32.mrb[23].mxu1  ;;  %1288 = vst [vmem:[#allocation2 + $0xf0] sm:$0xff] %v1192_v10  ;;  %1278 = vst [vmem:[#allocation2 + $0xa0] sm:$0xff] %v1182_v11  ;;  %v1195_v16 = vadd.f32 %v1753_v46, %v588_v8  ;;  %v1185_v17 = vadd.f32 %v1457_v9, %v1792_v52 }
 0x121   :  { %1289 = vst [vmem:[#allocation2 + $0xf8] sm:$0xff] %v1193_v14  ;;  %1272 = vst [vmem:[#allocation2 + $0x70] sm:$0xff] %v1176_v15  ;;  %v1196_v18 = vadd.f32 %v1756_v49, %v590_v12  ;;  %v1179_v19 = vadd.f32 %v1792_v52, %v746_v13 }
 0x122   :  { %1291 = vst [vmem:[#allocation2 + $0x108] sm:$0xff] %v1195_v16  ;;  %1281 = vst [vmem:[#allocation2 + $0xb8] sm:$0xff] %v1185_v17 }
 0x123   :  { %1292 = vst [vmem:[#allocation2 + $0x110] sm:$0xff] %v1196_v18  ;;  %1275 = vst [vmem:[#allocation2 + $0x88] sm:$0xff] %v1179_v19 }
 0x125   :  { %v594_v20 = vpop.f32.mrb[24].mxu0  ;;  %v1460_v21 = vpop.f32.mrb[24].mxu1 }
 0x126   :  { %v596_v22 = vpop.f32.mrb[25].mxu0  ;;  %v759_v23 = vpop.f32.mrb[25].mxu1  ;;  %v1198_v26 = vadd.f32 %v1753_v46, %v594_v20  ;;  %v1194_v27 = vadd.f32 %v1460_v21, %v1792_v52 }
 0x127   :  { %v598_v24 = vpop.f32.mrb[26].mxu0  ;;  %v1461_v25 = vpop.f32.mrb[26].mxu1  ;;  %v1199_v30 = vadd.f32 %v1756_v49, %v596_v22  ;;  %v1188_v31 = vadd.f32 %v1792_v52, %v759_v23 }
 0x128   :  { %v600_v28 = vpop.f32.mrb[27].mxu0  ;;  %v762_v29 = vpop.f32.mrb[27].mxu1  ;;  %1294 = vst [vmem:[#allocation2 + $0x120] sm:$0xff] %v1198_v26  ;;  %1290 = vst [vmem:[#allocation2 + $0x100] sm:$0xff] %v1194_v27  ;;  %v1201_v32 = vadd.f32 %v1753_v46, %v598_v24  ;;  %v1197_v33 = vadd.f32 %v1461_v25, %v1792_v52 }
 0x129   :  { %1295 = vst [vmem:[#allocation2 + $0x128] sm:$0xff] %v1199_v30  ;;  %1284 = vst [vmem:[#allocation2 + $0xd0] sm:$0xff] %v1188_v31  ;;  %v1202_v34 = vadd.f32 %v1756_v49, %v600_v28  ;;  %v1191_v35 = vadd.f32 %v1792_v52, %v762_v29 }
 0x12a   :  { %1297 = vst [vmem:[#allocation2 + $0x138] sm:$0xff] %v1201_v32  ;;  %1293 = vst [vmem:[#allocation2 + $0x118] sm:$0xff] %v1197_v33 }
 0x12b   :  { %1298 = vst [vmem:[#allocation2 + $0x140] sm:$0xff] %v1202_v34  ;;  %1287 = vst [vmem:[#allocation2 + $0xe8] sm:$0xff] %v1191_v35 }
 0x12d   :  { %v604_v36 = vpop.f32.mrb[28].mxu0  ;;  %v1464_v37 = vpop.f32.mrb[28].mxu1 }
 0x12e   :  { %v606_v38 = vpop.f32.mrb[29].mxu0  ;;  %v775_v39 = vpop.f32.mrb[29].mxu1  ;;  %v1204_v43 = vadd.f32 %v1753_v46, %v604_v36  ;;  %v1206_v45 = vadd.f32 %v1464_v37, %v1792_v52 }
 0x12f   :  { %v608_v40 = vpop.f32.mrb[30].mxu0  ;;  %v1465_v41 = vpop.f32.mrb[30].mxu1  ;;  %v1205_v50 = vadd.f32 %v1756_v49, %v606_v38  ;;  %v1200_v42 = vadd.f32 %v1792_v52, %v775_v39 }
 0x130   :  { %v610_v47 = vpop.f32.mrb[31].mxu0  ;;  %v778_v48 = vpop.f32.mrb[31].mxu1  ;;  %1300 = vst [vmem:[#allocation2 + $0x150] sm:$0xff] %v1204_v43  ;;  %1302 = vst [vmem:[#allocation2 + $0x160] sm:$0xff] %v1206_v45  ;;  %v1207_v51 = vadd.f32 %v1753_v46, %v608_v40  ;;  %v1209_v53 = vadd.f32 %v1465_v41, %v1792_v52 }
 0x131   :  { %1301 = vst [vmem:[#allocation2 + $0x158] sm:$0xff] %v1205_v50  ;;  %1296 = vst [vmem:[#allocation2 + $0x130] sm:$0xff] %v1200_v42  ;;  %v1208_v54 = vadd.f32 %v1756_v49, %v610_v47  ;;  %v1203_v55 = vadd.f32 %v1792_v52, %v778_v48 }
 0x132   :  { %1303 = vst [vmem:[#allocation2 + $0x168] sm:$0xff] %v1207_v51  ;;  %1305 = vst [vmem:[#allocation2 + $0x178] sm:$0xff] %v1209_v53 }
 0x133   :  { %1304 = vst [vmem:[#allocation2 + $0x170] sm:$0xff] %v1208_v54  ;;  %1299 = vst [vmem:[#allocation2 + $0x148] sm:$0xff] %v1203_v55 }
 0x135   :  { %v614_v56 = vpop.f32.mrb[32].mxu0  ;;  %v1468_v57 = vpop.f32.mrb[32].mxu1 }
 0x136   :  { %v616_v58 = vpop.f32.mrb[33].mxu0  ;;  %v791_v59 = vpop.f32.mrb[33].mxu1  ;;  %v1210_v62 = vadd.f32 %v1753_v46, %v614_v56  ;;  %v1218_v63 = vadd.f32 %v1468_v57, %v1792_v52 }
 0x137   :  { %v618_v60 = vpop.f32.mrb[34].mxu0  ;;  %v1469_v61 = vpop.f32.mrb[34].mxu1  ;;  %v1211_v1 = vadd.f32 %v1756_v49, %v616_v58  ;;  %v1212_v2 = vadd.f32 %v1792_v52, %v791_v59 }
 0x138   :  { %v620_v0 = vpop.f32.mrb[35].mxu0  ;;  %v794_v44 = vpop.f32.mrb[35].mxu1  ;;  %1306 = vst [vmem:[#allocation2 + $0x180] sm:$0xff] %v1210_v62  ;;  %1314 = vst [vmem:[#allocation2 + $0x1c0] sm:$0xff] %v1218_v63  ;;  %v1213_v3 = vadd.f32 %v1753_v46, %v618_v60  ;;  %v1221_v4 = vadd.f32 %v1469_v61, %v1792_v52 }
 0x139   :  { %1307 = vst [vmem:[#allocation2 + $0x188] sm:$0xff] %v1211_v1  ;;  %1308 = vst [vmem:[#allocation2 + $0x190] sm:$0xff] %v1212_v2  ;;  %v1214_v5 = vadd.f32 %v1756_v49, %v620_v0  ;;  %v1215_v6 = vadd.f32 %v1792_v52, %v794_v44 }
 0x13a   :  { %1309 = vst [vmem:[#allocation2 + $0x198] sm:$0xff] %v1213_v3  ;;  %1317 = vst [vmem:[#allocation2 + $0x1d8] sm:$0xff] %v1221_v4 }
 0x13b   :  { %1310 = vst [vmem:[#allocation2 + $0x1a0] sm:$0xff] %v1214_v5  ;;  %1311 = vst [vmem:[#allocation2 + $0x1a8] sm:$0xff] %v1215_v6 }
 0x13d   :  { %v624_v7 = vpop.f32.mrb[36].mxu0  ;;  %v1472_v8 = vpop.f32.mrb[36].mxu1 }
 0x13e   :  { %v626_v9 = vpop.f32.mrb[37].mxu0  ;;  %v807_v10 = vpop.f32.mrb[37].mxu1  ;;  %v1216_v13 = vadd.f32 %v1753_v46, %v624_v7  ;;  %v1230_v14 = vadd.f32 %v1472_v8, %v1792_v52 }
 0x13f   :  { %v628_v11 = vpop.f32.mrb[38].mxu0  ;;  %v1473_v12 = vpop.f32.mrb[38].mxu1  ;;  %v1217_v17 = vadd.f32 %v1756_v49, %v626_v9  ;;  %v1224_v18 = vadd.f32 %v1792_v52, %v807_v10 }
 0x140   :  { %v630_v15 = vpop.f32.mrb[39].mxu0  ;;  %v810_v16 = vpop.f32.mrb[39].mxu1  ;;  %1312 = vst [vmem:[#allocation2 + $0x1b0] sm:$0xff] %v1216_v13  ;;  %1326 = vst [vmem:[#allocation2 + $0x220] sm:$0xff] %v1230_v14  ;;  %v1219_v19 = vadd.f32 %v1753_v46, %v628_v11  ;;  %v1233_v20 = vadd.f32 %v1473_v12, %v1792_v52 }
 0x141   :  { %1313 = vst [vmem:[#allocation2 + $0x1b8] sm:$0xff] %v1217_v17  ;;  %1320 = vst [vmem:[#allocation2 + $0x1f0] sm:$0xff] %v1224_v18  ;;  %v1220_v21 = vadd.f32 %v1756_v49, %v630_v15  ;;  %v1227_v22 = vadd.f32 %v1792_v52, %v810_v16 }
 0x142   :  { %1315 = vst [vmem:[#allocation2 + $0x1c8] sm:$0xff] %v1219_v19  ;;  %1329 = vst [vmem:[#allocation2 + $0x238] sm:$0xff] %v1233_v20 }
 0x143   :  { %1316 = vst [vmem:[#allocation2 + $0x1d0] sm:$0xff] %v1220_v21  ;;  %1323 = vst [vmem:[#allocation2 + $0x208] sm:$0xff] %v1227_v22 }
 0x145   :  { %v634_v23 = vpop.f32.mrb[40].mxu0  ;;  %v1476_v24 = vpop.f32.mrb[40].mxu1 }
 0x146   :  { %v636_v25 = vpop.f32.mrb[41].mxu0  ;;  %v823_v26 = vpop.f32.mrb[41].mxu1  ;;  %v1222_v29 = vadd.f32 %v1753_v46, %v634_v23  ;;  %v1242_v30 = vadd.f32 %v1476_v24, %v1792_v52 }
 0x147   :  { %v638_v27 = vpop.f32.mrb[42].mxu0  ;;  %v1477_v28 = vpop.f32.mrb[42].mxu1  ;;  %v1223_v33 = vadd.f32 %v1756_v49, %v636_v25  ;;  %v1236_v34 = vadd.f32 %v1792_v52, %v823_v26 }
 0x148   :  { %v640_v31 = vpop.f32.mrb[43].mxu0  ;;  %v826_v32 = vpop.f32.mrb[43].mxu1  ;;  %1318 = vst [vmem:[#allocation2 + $0x1e0] sm:$0xff] %v1222_v29  ;;  %1338 = vst [vmem:[#allocation2 + $0x280] sm:$0xff] %v1242_v30  ;;  %v1225_v35 = vadd.f32 %v1753_v46, %v638_v27  ;;  %v1245_v36 = vadd.f32 %v1477_v28, %v1792_v52 }
 0x149   :  { %1319 = vst [vmem:[#allocation2 + $0x1e8] sm:$0xff] %v1223_v33  ;;  %1332 = vst [vmem:[#allocation2 + $0x250] sm:$0xff] %v1236_v34  ;;  %v1226_v37 = vadd.f32 %v1756_v49, %v640_v31  ;;  %v1239_v38 = vadd.f32 %v1792_v52, %v826_v32 }
 0x14a   :  { %1321 = vst [vmem:[#allocation2 + $0x1f8] sm:$0xff] %v1225_v35  ;;  %1341 = vst [vmem:[#allocation2 + $0x298] sm:$0xff] %v1245_v36 }
 0x14b   :  { %1322 = vst [vmem:[#allocation2 + $0x200] sm:$0xff] %v1226_v37  ;;  %1335 = vst [vmem:[#allocation2 + $0x268] sm:$0xff] %v1239_v38 }
 0x14d   :  { %v644_v39 = vpop.f32.mrb[44].mxu0  ;;  %v1480_v40 = vpop.f32.mrb[44].mxu1 }
 0x14e   :  { %v646_v41 = vpop.f32.mrb[45].mxu0  ;;  %v839_v43 = vpop.f32.mrb[45].mxu1  ;;  %v1228_v48 = vadd.f32 %v1753_v46, %v644_v39  ;;  %v1254_v50 = vadd.f32 %v1480_v40, %v1792_v52 }
 0x14f   :  { %v648_v45 = vpop.f32.mrb[46].mxu0  ;;  %v1481_v47 = vpop.f32.mrb[46].mxu1  ;;  %v1229_v53 = vadd.f32 %v1756_v49, %v646_v41  ;;  %v1248_v54 = vadd.f32 %v1792_v52, %v839_v43 }
 0x150   :  { %v650_v42 = vpop.f32.mrb[47].mxu0  ;;  %v842_v51 = vpop.f32.mrb[47].mxu1  ;;  %1324 = vst [vmem:[#allocation2 + $0x210] sm:$0xff] %v1228_v48  ;;  %1350 = vst [vmem:[#allocation2 + $0x2e0] sm:$0xff] %v1254_v50  ;;  %v1231_v55 = vadd.f32 %v1753_v46, %v648_v45  ;;  %v1257_v56 = vadd.f32 %v1481_v47, %v1792_v52 }
 0x151   :  { %1325 = vst [vmem:[#allocation2 + $0x218] sm:$0xff] %v1229_v53  ;;  %1344 = vst [vmem:[#allocation2 + $0x2b0] sm:$0xff] %v1248_v54  ;;  %v1232_v57 = vadd.f32 %v1756_v49, %v650_v42  ;;  %v1251_v58 = vadd.f32 %v1792_v52, %v842_v51 }
 0x152   :  { %1327 = vst [vmem:[#allocation2 + $0x228] sm:$0xff] %v1231_v55  ;;  %1353 = vst [vmem:[#allocation2 + $0x2f8] sm:$0xff] %v1257_v56 }
 0x153   :  { %1328 = vst [vmem:[#allocation2 + $0x230] sm:$0xff] %v1232_v57  ;;  %1347 = vst [vmem:[#allocation2 + $0x2c8] sm:$0xff] %v1251_v58 }
 0x154   :  { %1562 = shalt.err (!%p1559_p4)
}
 0x155   :  { %s1563_s15 = scalar_lea.hbm %s1873_s3, 12288 }
 0x156   :  { %p1564_p5 = scmp.ne.s32.totalorder %s1873_s3, %s1563_s15  ;;  %p1567_p6 = scmp.lt.u32.totalorder %s1563_s15, %s1873_s3 }
 0x158   :  { %p1569_p7 = pnand %p1567_p6, %p1564_p5 }
 0x15a   :  { %1572 = shalt.err (!%p1569_p7)
}
 0x15b   :  { %s1577_s20 = smov 384   ;;  %s1578_s21 = smov 24  }
 0x15c   :  { %1365 = dma.vmem_to_hbm [thread:$0]  %s1360_s11, 12288, %s1873_s3, [#allocation3], %s1577_s20, %s1577_s20, %s1578_s21  }
 0x15d   :  { %1573 = dma.done.wait [#allocation3], 12288  }
 0x15e   :  { %1574 = vsyncadd [#allocation3], 4294955008 }
 0x15f   :  { %1369 = vsyncpa [#allocation3], 1 }

</bundles_post_ra>
